<compile_context>
chip_gen: v5e
topology: v5e:2x2
jax: 0.10.0
libtpu: 0.0.40
codegen_flags: <defaults>
</compile_context>

<pallas_src>
import functools

import jax
import jax.numpy as jnp
from jax.experimental import pallas as pl
from jax.experimental.pallas import tpu as pltpu

LANES = 128
SUBLANES = 8
ROW_TILE = 2048   # (2048, 128) f32 tile = 1 MiB per input buffer per step


def _detect_num_cores() -> int:
    """2-way split only on generations with 2 TensorCores per chip (v7x)."""
    try:
        kind = jax.devices()[0].device_kind.lower()
    except Exception:
        return 1
    if "v7" in kind:
        return 2
    return 1


def _mse_partial_kernel(x_ref, y_ref, o_ref, acc_ref, *,
                        block_rows: int, valid_rows: int,
                        blocks_per_core: int, needs_mask: bool, inv_n: float):
    """Per-core partial of mean((x - y)^2), accumulated over the inner axis."""
    i = pl.program_id(1)

    @pl.when(i == 0)
    def _init():
        acc_ref[...] = jnp.zeros_like(acc_ref)

    d = x_ref[...].astype(jnp.float32) - y_ref[...].astype(jnp.float32)
    sq = d * d

    if not needs_mask:
        # Common case: every block is fully in range -> pure sub/mul/add.
        acc_ref[...] = acc_ref[...] + sq
    else:
        block_idx = pl.program_id(0) * blocks_per_core + i
        block_start = block_idx * block_rows
        is_full = block_start + block_rows <= valid_rows

        @pl.when(is_full)
        def _full_block():
            acc_ref[...] = acc_ref[...] + sq

        @pl.when(jnp.logical_not(is_full))
        def _ragged_block():
            # Only the partial last block (and any clamped duplicate block from
            # the core split) pays for the iota/compare/select.
            row_ids = block_start + jax.lax.broadcasted_iota(
                jnp.int32, sq.shape, 0)
            # Select, NOT multiply: out-of-range rows may hold Inf/NaN garbage.
            acc_ref[...] = acc_ref[...] + jnp.where(row_ids < valid_rows, sq, 0.0)

    @pl.when(i == pl.num_programs(1) - 1)
    def _finalize():
        partial_mse = jnp.sum(acc_ref[...]) * jnp.float32(inv_n)
        # Broadcast the per-core scalar across a fully (8,128)-aligned block.
        o_ref[...] = jnp.full((SUBLANES, LANES), partial_mse, dtype=jnp.float32)


def typer_loss(key_strokes: jax.Array, out_img: jax.Array,
               target_img: jax.Array) -> jax.Array:
    """Pallas implementation of TypeRLoss.forward. Returns scalar f32."""
    assert out_img.shape == target_img.shape
    # key_strokes is only used for shape unpacking in the reference module.
    b, key_dims, h, w = key_strokes.shape
    del b, key_dims, h, w

    n_elems = int(out_img.size)
    if n_elems == 0:
        return jnp.float32(0.0)

    flat_x = out_img.reshape(-1)
    flat_y = target_img.reshape(-1)

    rows = n_elems // LANES
    rem = n_elems - rows * LANES

    if rows == 0 or rem != 0:
        # Lane-misaligned element counts (rare for image tensors) or sub-128
        # inputs: a single fused XLA pass reads each operand exactly once —
        # cheaper than padding / slicing copies feeding a Pallas call.
        # TODO(synk): a fully general Pallas path would need a 1-D BlockSpec +
        # in-kernel lane mask for the trailing partial row.
        d = flat_x.astype(jnp.float32) - flat_y.astype(jnp.float32)
        return jnp.sum(d * d) / jnp.float32(n_elems)

    x2d = flat_x.reshape(rows, LANES)
    y2d = flat_y.reshape(rows, LANES)

    block_rows = min(ROW_TILE, rows)            # full-dim block for small inputs
    num_blocks = pl.cdiv(rows, block_rows)
    # Never split across more cores than there are blocks (tiny inputs would
    # otherwise generate a duplicate, fully-masked block of wasted traffic).
    num_cores = min(_detect_num_cores(), num_blocks)
    blocks_per_core = pl.cdiv(num_blocks, num_cores)
    needs_mask = num_cores * blocks_per_core * block_rows != rows

    if needs_mask:
        def in_map(c, i):
            # Clamp so duplicate iterations stay in bounds; their contribution
            # is masked out inside the kernel.
            return (jnp.minimum(c * blocks_per_core + i, num_blocks - 1), 0)
    else:
        def in_map(c, i):
            return (c * blocks_per_core + i, 0)

    kernel = functools.partial(
        _mse_partial_kernel,
        block_rows=block_rows,
        valid_rows=rows,
        blocks_per_core=blocks_per_core,
        needs_mask=needs_mask,
        inv_n=1.0 / n_elems,
    )

    itemsize = jnp.dtype(out_img.dtype).itemsize
    cost = pl.CostEstimate(
        flops=3 * n_elems,                 # sub + mul + add per element
        transcendentals=0,
        bytes_accessed=2 * n_elems * itemsize
                       + num_cores * SUBLANES * LANES * 4,
    )

    partials = pl.pallas_call(
        kernel,
        out_shape=jax.ShapeDtypeStruct((num_cores * SUBLANES, LANES),
                                       jnp.float32),
        grid_spec=pltpu.PrefetchScalarGridSpec(
            num_scalar_prefetch=0,
            grid=(num_cores, blocks_per_core),
            in_specs=[
                pl.BlockSpec((block_rows, LANES), in_map),
                pl.BlockSpec((block_rows, LANES), in_map),
            ],
            out_specs=pl.BlockSpec((SUBLANES, LANES), lambda c, i: (c, 0)),
            scratch_shapes=[pltpu.VMEM((block_rows, LANES), jnp.float32)],
        ),
        compiler_params=pltpu.CompilerParams(
            # TODO(synk): on v7x, verify in xprof that "parallel" shards the
            # leading axis across both TensorCores; if not, switch to
            # (pltpu.CORE_PARALLEL, pltpu.ARBITRARY).
            dimension_semantics=("parallel", "arbitrary")),
        cost_estimate=cost,
    )(x2d, y2d)

    # Each core broadcast its (already 1/n-scaled) partial across its own
    # (8,128) output block; pick one element per core and add them.
    per_core = partials.reshape(num_cores, SUBLANES, LANES)[:, 0, 0]
    return jnp.sum(per_core)


if __name__ == "__main__":
    key = jax.random.PRNGKey(0)
    k1, k2, k3 = jax.random.split(key, 3)

    # Small shapes consistent with the module's forward signature.
    key_strokes = jax.random.normal(k1, (2, 4, 16, 16), dtype=jnp.float32)
    out_img = jax.random.normal(k2, (2, 1, 16, 16), dtype=jnp.float32)
    target_img = jax.random.normal(k3, (2, 1, 16, 16), dtype=jnp.float32)

    loss = typer_loss(key_strokes, out_img, target_img)
    loss = jax.block_until_ready(loss)

    ref = jnp.mean((out_img - target_img).astype(jnp.float32) ** 2)
    assert jnp.allclose(loss, ref, rtol=1e-5, atol=1e-6), (loss, ref)

    # Secondary check: exercise the gated ragged-row mask path (rows not a
    # multiple of the row tile -> last block is partial). Still modest sized.
    k4, k5 = jax.random.split(k3)
    out_big = jax.random.normal(k4, (2, 3, 256, 256), dtype=jnp.float32)
    tgt_big = jax.random.normal(k5, (2, 3, 256, 256), dtype=jnp.float32)
    ks_big = jnp.zeros((2, 4, 256, 256), dtype=jnp.float32)
    loss_big = jax.block_until_ready(typer_loss(ks_big, out_big, tgt_big))
    ref_big = jnp.mean((out_big - tgt_big) ** 2)
    assert jnp.allclose(loss_big, ref_big, rtol=1e-5, atol=1e-6), (loss_big,
                                                                   ref_big)

    print("KERNEL_OK")
</pallas_src>

<mosaic_0001>
module attributes {stable_mosaic.version = 11 : i64} {
  func.func @_mse_partial_kernel(%arg0: i32, %arg1: i32, %arg2: memref<4x128xf32, #tpu.memory_space<vmem>>, %arg3: memref<4x128xf32, #tpu.memory_space<vmem>>, %arg4: memref<8x128xf32, #tpu.memory_space<vmem>>, %arg5: memref<4x128xf32, #tpu.memory_space<vmem>>) attributes {dimension_semantics = [#tpu.dimension_semantics<parallel>, #tpu.dimension_semantics<arbitrary>], iteration_bounds = array<i64: 1, 1>, scalar_prefetch = 0 : i64, scratch_operands = 1 : i64, tpu.core_type = #tpu.core_type<tc>, window_params = [{transform_indices = @transform_0, window_bounds = array<i64: 4, 128>}, {transform_indices = @transform_1, window_bounds = array<i64: 4, 128>}, {transform_indices = @transform_2, window_bounds = array<i64: 8, 128>}]} {
    %c0_i32 = arith.constant 0 : i32
    %0 = arith.cmpi eq, %arg1, %c0_i32 : i32
    %1 = arith.extui %0 : i1 to i32
    %c0_i32_0 = arith.constant 0 : i32
    %2 = arith.cmpi ne, %1, %c0_i32_0 : i32
    scf.if %2 {
      %cst = arith.constant 0.000000e+00 : f32
      %13 = vector.broadcast %cst : f32 to vector<4x128xf32>
      %c0_10 = arith.constant 0 : index
      %c0_11 = arith.constant 0 : index
      %14 = vector.load %arg5[%c0_10, %c0_11] : memref<4x128xf32, #tpu.memory_space<vmem>>, vector<4x128xf32>
      tpu.vector_store %arg5[%c0_10, %c0_11], %13 {strides = array<i32>} : memref<4x128xf32, #tpu.memory_space<vmem>>, vector<4x128xf32>,
    } else {
    }
    %c0 = arith.constant 0 : index
    %c0_1 = arith.constant 0 : index
    %3 = vector.load %arg2[%c0, %c0_1] : memref<4x128xf32, #tpu.memory_space<vmem>>, vector<4x128xf32>
    %c0_2 = arith.constant 0 : index
    %c0_3 = arith.constant 0 : index
    %4 = vector.load %arg3[%c0_2, %c0_3] : memref<4x128xf32, #tpu.memory_space<vmem>>, vector<4x128xf32>
    %5 = arith.subf %3, %4 : vector<4x128xf32>
    %6 = arith.mulf %5, %5 : vector<4x128xf32>
    %c0_4 = arith.constant 0 : index
    %c0_5 = arith.constant 0 : index
    %7 = vector.load %arg5[%c0_4, %c0_5] : memref<4x128xf32, #tpu.memory_space<vmem>>, vector<4x128xf32>
    %8 = arith.addf %7, %6 : vector<4x128xf32>
    %c0_6 = arith.constant 0 : index
    %c0_7 = arith.constant 0 : index
    %9 = vector.load %arg5[%c0_6, %c0_7] : memref<4x128xf32, #tpu.memory_space<vmem>>, vector<4x128xf32>
    tpu.vector_store %arg5[%c0_6, %c0_7], %8 {strides = array<i32>} : memref<4x128xf32, #tpu.memory_space<vmem>>, vector<4x128xf32>,
    %c0_i32_8 = arith.constant 0 : i32
    %10 = arith.cmpi eq, %arg1, %c0_i32_8 : i32
    %11 = arith.extui %10 : i1 to i32
    %c0_i32_9 = arith.constant 0 : i32
    %12 = arith.cmpi ne, %11, %c0_i32_9 : i32
    scf.if %12 {
      %c0_10 = arith.constant 0 : index
      %c0_11 = arith.constant 0 : index
      %13 = vector.load %arg5[%c0_10, %c0_11] : memref<4x128xf32, #tpu.memory_space<vmem>>, vector<4x128xf32>
      %14 = vector.shape_cast %13 : vector<4x128xf32> to vector<1x4x128xf32>
      %cst = arith.constant dense<0.000000e+00> : vector<1xf32>
      %15 = vector.multi_reduction <add>, %14, %cst [1, 2] : vector<1x4x128xf32> to vector<1xf32>
      %16 = vector.shape_cast %15 : vector<1xf32> to vector<1x1x1xf32>
      %17 = vector.extract %16[0, 0, 0] : f32 from vector<1x1x1xf32>
      %cst_12 = arith.constant 0.001953125 : f32
      %18 = arith.mulf %17, %cst_12 : f32
      %19 = vector.broadcast %18 : f32 to vector<8x128xf32>
      %c0_13 = arith.constant 0 : index
      %c0_14 = arith.constant 0 : index
      %20 = vector.load %arg4[%c0_13, %c0_14] : memref<8x128xf32, #tpu.memory_space<vmem>>, vector<8x128xf32>
      tpu.vector_store %arg4[%c0_13, %c0_14], %19 {strides = array<i32>} : memref<8x128xf32, #tpu.memory_space<vmem>>, vector<8x128xf32>,
    } else {
    }
    return
  }
  func.func @transform_0(%arg0: i32, %arg1: i32) -> (i32, i32) {
    %c1_i32 = arith.constant 1 : i32
    %0 = arith.muli %arg0, %c1_i32 : i32
    %1 = arith.addi %0, %arg1 : i32
    %c0_i32 = arith.constant 0 : i32
    %c0_i32_0 = arith.constant 0 : i32
    return %1, %c0_i32 : i32, i32
  }
  func.func @transform_1(%arg0: i32, %arg1: i32) -> (i32, i32) {
    %c1_i32 = arith.constant 1 : i32
    %0 = arith.muli %arg0, %c1_i32 : i32
    %1 = arith.addi %0, %arg1 : i32
    %c0_i32 = arith.constant 0 : i32
    %c0_i32_0 = arith.constant 0 : i32
    return %1, %c0_i32 : i32, i32
  }
  func.func @transform_2(%arg0: i32, %arg1: i32) -> (i32, i32) {
    %c0_i32 = arith.constant 0 : i32
    %c0_i32_0 = arith.constant 0 : i32
    return %arg0, %c0_i32 : i32, i32
  }
}

</mosaic_0001>

<bundles_post_ra>
// kernel: tpu_custom_call.1
= control target key start
LH: loop header
LB: loop body
LE: loop exit
PB: predicated region body
PF: predicated region fallthrough
CT: control target
= control target key end

     0   :  { %7 = vsyncpa [#allocation4], 0  ;;  %s208_s0 = inlined_call_operand.hbm [shape: f32[4,128], index: 0, kind: input, shape index: {}]   ;;  %s209_s1 = inlined_call_operand.hbm [shape: f32[4,128], index: 1, kind: input, shape index: {}]   ;;  %s210_s2 = inlined_call_operand.hbm [shape: f32[8,128], index: 2, kind: output, shape index: {}]  }
   0x1   :  { %8 = vsyncpa [#allocation7], 0 }
   0x2   :  { %9 = vsyncpa [#allocation5], 0  ;;  %s18_s11 = sshll.u32 %s208_s0, 4  ;;  %s180_s12 = smov [#allocation3]   ;;  %s19_s11 = int_to_ptr.hbm [resolvable:$true] %s18_s11 }
   0x3   :  { %s20_s13 = sshll.u32 %s180_s12, 4  ;;  %s32_s16 = sshll.u32 %s209_s1, 4  ;;  %s21_s13 = int_to_ptr.vmem [resolvable:$true] %s20_s13  ;;  %s33_s16 = int_to_ptr.hbm [resolvable:$true] %s32_s16 }
   0x4   :  { %23 = dma.hbm_to_vmem [thread:$0]  %s19_s11, 64, %s21_s13, [#allocation4]  }
   0x5   :  { %s181_s17 = smov [#allocation6]  }
   0x6   :  { %s34_s18 = sshll.u32 %s181_s17, 4  ;;  %s35_s18 = int_to_ptr.vmem [resolvable:$true] %s34_s18 }
   0x7   :  { %37 = dma.hbm_to_vmem [thread:$0]  %s33_s16, 64, %s35_s18, [#allocation7]  }
   0x8   :  { %174 = dma.done.wait [#allocation4], 64  }
   0x9   :  { %175 = vsyncadd [#allocation4], 4294967232 }
   0xa   :  { %176 = dma.done.wait [#allocation7], 64  }
   0xb   :  { %177 = vsyncadd [#allocation7], 4294967232  ;;  %v182_v0 = vmov 0.0   ;;  %v53_v1 = vld [vmem:[#allocation3] sm:$0xf]  ;;  %vm64_vm0 = vcmask 1043456  }
   0xc   :  { %52 = vst [vmem:[#allocation2] sm:$0xf] %v182_v0  ;;  %v54_v2 = vld [vmem:[#allocation6] sm:$0xf]  ;;  %s183_s0 = smov [#allocation8]   ;;  %s85_s21 = sshll.u32 %s210_s2, 4  ;;  %s86_s21 = int_to_ptr.hbm [resolvable:$true] %s85_s21 }
   0xd   :  { %v55_v3 = vsub.f32 %v53_v1, %v54_v2  ;;  %s83_s1 = sshll.u32 %s183_s0, 4  ;;  %s84_s1 = int_to_ptr.vmem [resolvable:$true] %s83_s1 }
   0xf   :  { %v56_v5 = vmul.f32 %v55_v3, %v55_v3 }
  0x13   :  { %v57_v4 = vld [vmem:[#allocation2] sm:$0xf] }
  0x14   :  { %v58_v6 = vadd.f32 %v57_v4, %v56_v5 }
  0x16   :  { %59 = vst [vmem:[#allocation2] sm:$0xf] %v58_v6 }
  0x1d   :  { %v63_v7 = vld [vmem:[#allocation2] sm:$0xf] }
  0x1e   :  { %v65_v8 = vsel %vm64_vm0, %v63_v7, 0.0 }
  0x1f   :  { %66 = vadd.xlane.f32.xlu0 %v65_v8 }
  0x92   :  { %v67_v9 = vpop.xlane.xlu0 %66 }
  0x93   :  { %v68_v10 = vrot.slane %v67_v9, 4 }
  0x95   :  { %v69_v11 = vadd.f32 %v68_v10, %v67_v9 }
  0x97   :  { %v70_v12 = vrot.slane %v69_v11, 2 }
  0x99   :  { %v71_v13 = vadd.f32 %v70_v12, %v69_v11 }
  0x9b   :  { %v72_v14 = vrot.slane %v71_v13, 1 }
  0x9d   :  { %v73_v15 = vadd.f32 %v72_v14, %v71_v13 }
  0x9f   :  { %96 = vpush %v73_v15 }
  0xd0   :  { %s97_s22 = spop %96 }
  0xd1   :  { %s75_s23 = smul.f32 0.001953125, %s97_s22 }
  0xd3   :  { %v76_v16 = vstv %s75_s23 }
  0xd4   :  { %77 = vst [vmem:[#allocation8] sm:$0xff] %v76_v16 }
  0xd5   :  { %88 = dma.vmem_to_hbm [thread:$0]  %s84_s1, 128, %s86_s21, [#allocation5]  }
  0xd6   :  { %178 = dma.done.wait [#allocation5], 128  }
  0xd7   :  { %179 = vsyncadd [#allocation5], 4294967168 }
  0xd8   :  { %93 = vsyncpa [#allocation4], 1 }
  0xd9   :  { %94 = vsyncpa [#allocation7], 1 }
  0xda   :  { %95 = vsyncpa [#allocation5], 1 }

</bundles_post_ra>
